<compile_context>
chip_gen: v7x
topology: tpu7x:2x2x1
jax: 0.10.0
libtpu: 0.0.40
codegen_flags: <defaults>
</compile_context>

<pallas_src>
import functools

import jax
import jax.numpy as jnp
from jax.experimental import pallas as pl
from jax.experimental.pallas import tpu as pltpu


def _round_up(x, m):
    return ((x + m - 1) // m) * m


# ----------------------------- Pallas kernel ------------------------------ #
def _mlp_kernel(idx_ref, fs_ref,
                wf_ref, b1_ref, w2_ref, b2_ref, w3_ref, b3_ref,
                o_ref, x_ref, *, ne_c, ne):
    """Fused one-hot embedding gather + 3-layer MLP.

    Transposed formulation (features on sublanes, batch on lanes): every
    intermediate -- h1:(24,TB), h2:(12,TB), y:(1,TB) -- and the output are
    lane-dense. All matmuls are bf16 operands / f32 accumulation on the MXU.
    """
    f32 = jnp.float32
    bf16 = jnp.bfloat16
    tb = o_ref.shape[1]                                   # batch tile (lanes)

    # --- combined one-hot for both embedding tables (rows: [cidx | slot]) ---
    idx = idx_ref[...]                                    # (2, TB) int32
    cidx = idx[0:1, :]                                    # (1, TB)
    slot = idx[1:2, :] + ne_c                             # offset into combined rows
    rows = jax.lax.broadcasted_iota(jnp.int32, (ne, tb), 0)
    onehot = ((rows == cidx) | (rows == slot)).astype(f32).astype(bf16)

    # --- single fused layer-1 operand: [one-hot ; fs^T] in a bf16 scratch ---
    x_ref[0:ne, :] = onehot                               # (ne, TB)
    x_ref[ne:, :] = fs_ref[...]                           # (fs_dim, TB)

    # Layer 1: ONE K = (num_cidx + num_slot + fs_dim) matmul (embeddings are
    # pre-folded into wf), f32 accumulate.
    h1 = jnp.dot(wf_ref[...], x_ref[...], preferred_element_type=f32)
    h1 = jnp.maximum(h1 + b1_ref[...], 0.0)               # (24, TB)
    # Dropout(0.1) -> identity in eval mode.

    # Layer 2.
    h2 = jnp.dot(w2_ref[...], h1.astype(bf16), preferred_element_type=f32)
    h2 = jnp.maximum(h2 + b2_ref[...], 0.0)               # (12, TB)
    # Dropout(0.1) -> identity in eval mode.

    # Layer 3: lane-dense (1, TB) output.
    y = jnp.dot(w3_ref[...], h2.astype(bf16), preferred_element_type=f32)
    o_ref[...] = y + b3_ref[0, 0]


def mlp_forward_pallas(cidxs, slots, fs, kparams, *, tile_batch=16384):
    """Fused embedding-gather + 3-layer MLP forward on TPU.

    cidxs, slots: (B,) integer indices; fs: (B, fs_dim) float32.
    Returns (B,) float32.
    """
    (w_fused, b1c, w2t, b2c, w3t, b3, num_cidx, num_slot) = kparams
    B, fs_dim = fs.shape
    ne = num_cidx + num_slot
    k_fused = ne + fs_dim
    d1, d2, d3 = w_fused.shape[0], w2t.shape[0], w3t.shape[0]

    # Pad only for lane alignment (multiple of 128); the ragged last grid
    # block is handled by Pallas (garbage lanes are never stored back).
    Bp = _round_up(max(B, 1), 128)
    TB = min(_round_up(int(tile_batch), 128), Bp)
    nb = pl.cdiv(Bp, TB)
    pad = Bp - B

    idx = jnp.stack([cidxs.astype(jnp.int32), slots.astype(jnp.int32)], axis=0)
    idx = jnp.pad(idx, ((0, 0), (0, pad)))                          # (2, Bp)
    fs_t = jnp.pad(fs.astype(jnp.bfloat16).T, ((0, 0), (0, pad)))   # (fs_dim, Bp)

    def const_spec(a):   # full-array block, VMEM-resident across the grid
        return pl.BlockSpec(a.shape, lambda i: (0, 0))

    cost = pl.CostEstimate(
        flops=2 * Bp * (d1 * k_fused + d2 * d1 + d3 * d2),
        transcendentals=0,
        bytes_accessed=int(Bp * (2 * 4 + fs_dim * 2 + 4)
                           + 2 * (w_fused.size + w2t.size + w3t.size)
                           + 4 * (b1c.size + b2c.size + b3.size)))

    kernel = functools.partial(_mlp_kernel, ne_c=int(num_cidx), ne=int(ne))

    out = pl.pallas_call(
        kernel,
        out_shape=jax.ShapeDtypeStruct((1, Bp), jnp.float32),
        grid=(nb,),
        in_specs=[
            pl.BlockSpec((2, TB), lambda i: (0, i)),        # packed [cidx; slot]
            pl.BlockSpec((fs_dim, TB), lambda i: (0, i)),   # fs^T, lane-dense
            const_spec(w_fused),                            # fused layer-1 weight (bf16)
            const_spec(b1c),                                # b1 (24,1) f32
            const_spec(w2t),                                # W2^T (12,24) bf16
            const_spec(b2c),                                # b2 (12,1) f32
            const_spec(w3t),                                # W3^T (1,12) bf16
            pl.BlockSpec(memory_space=pltpu.MemorySpace.SMEM),  # b3 scalar
        ],
        out_specs=pl.BlockSpec((1, TB), lambda i: (0, i)),
        scratch_shapes=[pltpu.VMEM((k_fused, TB), jnp.bfloat16)],
        compiler_params=pltpu.CompilerParams(
            # Batch grid shards across both TensorCores on v7x.
            dimension_semantics=("parallel",),
        ),
        cost_estimate=cost,
    )(idx, fs_t, w_fused, b1c, w2t, b2c, w3t, b3)

    return out.reshape(-1)[:B]


# ------------------------------ Model wrapper ------------------------------ #
class FineRecModel:
    """JAX/Pallas port of the PyTorch Model (forward pass, eval mode)."""

    FF_DIMS = (24, 24, 12, 1)

    def __init__(self, dim_cidx, num_cidx, dim_slot, num_slot, key):
        keys = jax.random.split(key, 8)
        self.dim_cidx, self.dim_slot = dim_cidx, dim_slot
        self.num_cidx, self.num_slot = num_cidx, num_slot
        self.emb_cidx = jax.random.normal(keys[0], (num_cidx, dim_cidx), jnp.float32)
        self.emb_slot = jax.random.normal(keys[1], (num_slot, dim_slot), jnp.float32)

        d = self.FF_DIMS
        # Weights stored as (in, out); deterministic synthetic init.
        self.w1 = jax.random.normal(keys[2], (d[0], d[1]), jnp.float32) * (1.0 / jnp.sqrt(d[0]))
        self.b1 = jax.random.normal(keys[3], (1, d[1]), jnp.float32) * 0.01
        self.w2 = jax.random.normal(keys[4], (d[1], d[2]), jnp.float32) * (1.0 / jnp.sqrt(d[1]))
        self.b2 = jax.random.normal(keys[5], (1, d[2]), jnp.float32) * 0.01
        self.w3 = jax.random.normal(keys[6], (d[2], d[3]), jnp.float32) * (1.0 / jnp.sqrt(d[2]))
        self.b3 = jax.random.normal(keys[7], (1, d[3]), jnp.float32) * 0.01

        # Kernel-layout parameters: fold both embedding tables into layer 1
        # (folded in f32, stored bf16) and pre-concatenate into ONE fused
        # (24, num_cidx + num_slot + fs_dim) weight so the hstack + gathers
        # collapse into a single K=24 matmul in the kernel.
        dc, ds = dim_cidx, dim_slot
        a_c = self.emb_cidx @ self.w1[:dc]                 # (num_cidx, 24)
        a_s = self.emb_slot @ self.w1[dc:dc + ds]          # (num_slot, 24)
        w1f = self.w1[dc + ds:]                            # (fs_dim, 24)
        w_fused = jnp.concatenate([a_c, a_s, w1f], axis=0).T
        self._kparams = (
            w_fused.astype(jnp.bfloat16),                  # (24, nc+ns+fs_dim)
            self.b1.reshape(-1, 1),                        # (24, 1) f32
            self.w2.T.astype(jnp.bfloat16),                # (12, 24)
            self.b2.reshape(-1, 1),                        # (12, 1) f32
            self.w3.T.astype(jnp.bfloat16),                # (1, 12)
            self.b3.reshape(1, 1),                         # (1, 1) scalar -> SMEM
            num_cidx, num_slot,
        )

    def forward(self, cidxs, slots, fs, *, tile_batch=16384):
        # NOTE: the one-hot equality gather maps out-of-range indices to a
        # zero embedding rather than raising, unlike torch.nn.Embedding.
        # TODO(synk): Dropout(0.1) is identity here (eval); training-mode masks
        # would need pltpu.prng_* inside the kernel.
        return mlp_forward_pallas(cidxs, slots, fs, self._kparams,
                                  tile_batch=tile_batch)


# ------------------------------- references -------------------------------- #
def _reference_forward_f32(model, cidxs, slots, fs):
    """Exact f32 forward (torch semantics, eval mode)."""
    cidx_emb = jnp.take(model.emb_cidx, cidxs, axis=0)
    slot_emb = jnp.take(model.emb_slot, slots, axis=0)
    x = jnp.concatenate([cidx_emb, slot_emb, fs], axis=1)
    h1 = jnp.maximum(x @ model.w1 + model.b1, 0.0)
    h2 = jnp.maximum(h1 @ model.w2 + model.b2, 0.0)
    return (h2 @ model.w3 + model.b3).reshape(-1)


def _reference_forward_kernel_precision(model, cidxs, slots, fs):
    """Mimics the kernel's bf16-operand / f32-accumulate arithmetic."""
    f32, bf16 = jnp.float32, jnp.bfloat16
    w_fused, b1c, w2t, b2c, w3t, b3, n_c, n_s = model._kparams
    B = fs.shape[0]
    oh = jnp.zeros((B, n_c + n_s), f32)
    oh = oh.at[jnp.arange(B), cidxs].set(1.0)
    oh = oh.at[jnp.arange(B), n_c + slots].set(1.0)
    x = jnp.concatenate([oh, fs], axis=1).astype(bf16)
    h1 = jnp.maximum(jnp.dot(x, w_fused.T, preferred_element_type=f32)
                     + b1c.reshape(1, -1), 0.0)
    h2 = jnp.maximum(jnp.dot(h1.astype(bf16), w2t.T, preferred_element_type=f32)
                     + b2c.reshape(1, -1), 0.0)
    y = jnp.dot(h2.astype(bf16), w3t.T, preferred_element_type=f32) + b3.reshape(1, -1)
    return y.reshape(-1)


# ---------------------------------- main ----------------------------------- #
if __name__ == "__main__":
    key = jax.random.PRNGKey(0)
    k_model, k1, k2, k3, k4, k5, k6 = jax.random.split(key, 7)

    # dim_cidx + dim_slot + fs_dim = 8 + 8 + 8 = 24 (MLP input width).
    dim_cidx, num_cidx = 8, 10
    dim_slot, num_slot = 8, 6
    fs_dim = 8

    model = FineRecModel(dim_cidx, num_cidx, dim_slot, num_slot, k_model)

    # Case 1: tiny batch (single grid block, padded to one 128-lane tile).
    B = 8
    cidxs = jax.random.randint(k1, (B,), 0, num_cidx, dtype=jnp.int32)
    slots = jax.random.randint(k2, (B,), 0, num_slot, dtype=jnp.int32)
    fs = jax.random.normal(k3, (B, fs_dim), jnp.float32)

    y = jax.block_until_ready(model.forward(cidxs, slots, fs))
    assert y.shape == (B,)
    y_kp = _reference_forward_kernel_precision(model, cidxs, slots, fs)
    y_f32 = _reference_forward_f32(model, cidxs, slots, fs)
    assert jnp.allclose(y, y_kp, atol=2e-2, rtol=2e-2)     # kernel structure
    assert jnp.allclose(y, y_f32, atol=2e-1, rtol=1e-1)    # bf16 vs f32 semantics

    # Case 2: multi-block grid with a ragged last block (B=300, TB=256).
    B2 = 300
    cidxs2 = jax.random.randint(k4, (B2,), 0, num_cidx, dtype=jnp.int32)
    slots2 = jax.random.randint(k5, (B2,), 0, num_slot, dtype=jnp.int32)
    fs2 = jax.random.normal(k6, (B2, fs_dim), jnp.float32)

    y2 = jax.block_until_ready(model.forward(cidxs2, slots2, fs2, tile_batch=256))
    assert y2.shape == (B2,)
    y2_kp = _reference_forward_kernel_precision(model, cidxs2, slots2, fs2)
    y2_f32 = _reference_forward_f32(model, cidxs2, slots2, fs2)
    assert jnp.allclose(y2, y2_kp, atol=2e-2, rtol=2e-2)
    assert jnp.allclose(y2, y2_f32, atol=2e-1, rtol=1e-1)

    print("KERNEL_OK")
</pallas_src>

<mosaic_0001>
module attributes {stable_mosaic.version = 11 : i64} {
  func.func @_mlp_kernel(%arg0: i32, %arg1: memref<2x128xi32, #tpu.memory_space<vmem>>, %arg2: memref<8x128xbf16, #tpu.memory_space<vmem>>, %arg3: memref<24x24xbf16, #tpu.memory_space<vmem>>, %arg4: memref<24x1xf32, #tpu.memory_space<vmem>>, %arg5: memref<12x24xbf16, #tpu.memory_space<vmem>>, %arg6: memref<12x1xf32, #tpu.memory_space<vmem>>, %arg7: memref<1x12xbf16, #tpu.memory_space<vmem>>, %arg8: memref<1x1xf32, #tpu.memory_space<smem>>, %arg9: memref<1x128xf32, #tpu.memory_space<vmem>>, %arg10: memref<24x128xbf16, #tpu.memory_space<vmem>>) attributes {dimension_semantics = [#tpu.dimension_semantics<parallel>], iteration_bounds = array<i64: 1>, scalar_prefetch = 0 : i64, scratch_operands = 1 : i64, tpu.core_type = #tpu.core_type<tc>, window_params = [{transform_indices = @transform_0, window_bounds = array<i64: 2, 128>}, {transform_indices = @transform_1, window_bounds = array<i64: 8, 128>}, {pipeline_mode = #tpu.pipeline_mode<synchronous>, transform_indices = @transform_2, window_bounds = array<i64: 24, 24>}, {pipeline_mode = #tpu.pipeline_mode<synchronous>, transform_indices = @transform_3, window_bounds = array<i64: 24, 1>}, {pipeline_mode = #tpu.pipeline_mode<synchronous>, transform_indices = @transform_4, window_bounds = array<i64: 12, 24>}, {pipeline_mode = #tpu.pipeline_mode<synchronous>, transform_indices = @transform_5, window_bounds = array<i64: 12, 1>}, {pipeline_mode = #tpu.pipeline_mode<synchronous>, transform_indices = @transform_6, window_bounds = array<i64: 1, 12>}, {transform_indices = @transform_7, window_bounds = array<i64: 1, 1>}, {transform_indices = @transform_8, window_bounds = array<i64: 1, 128>}]} {
    %c0 = arith.constant 0 : index
    %c0_0 = arith.constant 0 : index
    %0 = vector.load %arg1[%c0, %c0_0] : memref<2x128xi32, #tpu.memory_space<vmem>>, vector<2x128xi32>
    %1 = vector.extract_strided_slice %0 {offsets = [0, 0], sizes = [1, 128], strides = [1, 1]} : vector<2x128xi32> to vector<1x128xi32>
    %2 = vector.extract_strided_slice %0 {offsets = [1, 0], sizes = [1, 128], strides = [1, 1]} : vector<2x128xi32> to vector<1x128xi32>
    %c10_i32 = arith.constant 10 : i32
    %3 = vector.broadcast %c10_i32 : i32 to vector<1x128xi32>
    %4 = arith.addi %2, %3 : vector<1x128xi32>
    %5 = tpu.iota {dimensions = array<i32: 0>} : vector<16x128xi32>
    %6 = vector.broadcast %1 : vector<1x128xi32> to vector<16x128xi32>
    %7 = arith.cmpi eq, %5, %6 : vector<16x128xi32>
    %8 = vector.broadcast %4 : vector<1x128xi32> to vector<16x128xi32>
    %9 = arith.cmpi eq, %5, %8 : vector<16x128xi32>
    %10 = arith.ori %7, %9 : vector<16x128xi1>
    %11 = arith.extui %10 : vector<16x128xi1> to vector<16x128xi32>
    %12 = arith.sitofp %11 : vector<16x128xi32> to vector<16x128xf32>
    %13 = arith.truncf %12 : vector<16x128xf32> to vector<16x128xbf16>
    %c0_1 = arith.constant 0 : index
    %c0_2 = arith.constant 0 : index
    %14 = vector.load %arg10[%c0_1, %c0_2] : memref<24x128xbf16, #tpu.memory_space<vmem>>, vector<16x128xbf16>
    tpu.vector_store %arg10[%c0_1, %c0_2], %13 {strides = array<i32>} : memref<24x128xbf16, #tpu.memory_space<vmem>>, vector<16x128xbf16>,
    %c0_3 = arith.constant 0 : index
    %c0_4 = arith.constant 0 : index
    %15 = vector.load %arg2[%c0_3, %c0_4] : memref<8x128xbf16, #tpu.memory_space<vmem>>, vector<8x128xbf16>
    %c16 = arith.constant 16 : index
    %c0_5 = arith.constant 0 : index
    %16 = vector.load %arg10[%c16, %c0_5] : memref<24x128xbf16, #tpu.memory_space<vmem>>, vector<8x128xbf16>
    tpu.vector_store %arg10[%c16, %c0_5], %15 {strides = array<i32>} : memref<24x128xbf16, #tpu.memory_space<vmem>>, vector<8x128xbf16>,
    %c0_6 = arith.constant 0 : index
    %c0_7 = arith.constant 0 : index
    %17 = vector.load %arg3[%c0_6, %c0_7] : memref<24x24xbf16, #tpu.memory_space<vmem>>, vector<24x24xbf16>
    %c0_8 = arith.constant 0 : index
    %c0_9 = arith.constant 0 : index
    %18 = vector.load %arg10[%c0_8, %c0_9] : memref<24x128xbf16, #tpu.memory_space<vmem>>, vector<24x128xbf16>
    %cst = arith.constant dense<0.000000e+00> : vector<24x128xf32>
    %19 = tpu.matmul %17, %18, %cst {dimension_numbers = #tpu.dot_dimension_numbers<[1], [0], [0], [1], [0, 0, 1, 1], [], []>} : vector<24x24xbf16>, vector<24x128xbf16>, vector<24x128xf32> -> vector<24x128xf32>
    %c0_10 = arith.constant 0 : index
    %c0_11 = arith.constant 0 : index
    %20 = vector.load %arg4[%c0_10, %c0_11] : memref<24x1xf32, #tpu.memory_space<vmem>>, vector<24x1xf32>
    %21 = vector.broadcast %20 : vector<24x1xf32> to vector<24x128xf32>
    %22 = arith.addf %19, %21 : vector<24x128xf32>
    %cst_12 = arith.constant 0.000000e+00 : f32
    %23 = vector.broadcast %cst_12 : f32 to vector<24x128xf32>
    %24 = arith.maximumf %22, %23 : vector<24x128xf32>
    %c0_13 = arith.constant 0 : index
    %c0_14 = arith.constant 0 : index
    %25 = vector.load %arg5[%c0_13, %c0_14] : memref<12x24xbf16, #tpu.memory_space<vmem>>, vector<12x24xbf16>
    %26 = arith.truncf %24 : vector<24x128xf32> to vector<24x128xbf16>
    %cst_15 = arith.constant dense<0.000000e+00> : vector<12x128xf32>
    %27 = tpu.matmul %25, %26, %cst_15 {dimension_numbers = #tpu.dot_dimension_numbers<[1], [0], [0], [1], [0, 0, 1, 1], [], []>} : vector<12x24xbf16>, vector<24x128xbf16>, vector<12x128xf32> -> vector<12x128xf32>
    %c0_16 = arith.constant 0 : index
    %c0_17 = arith.constant 0 : index
    %28 = vector.load %arg6[%c0_16, %c0_17] : memref<12x1xf32, #tpu.memory_space<vmem>>, vector<12x1xf32>
    %29 = vector.broadcast %28 : vector<12x1xf32> to vector<12x128xf32>
    %30 = arith.addf %27, %29 : vector<12x128xf32>
    %cst_18 = arith.constant 0.000000e+00 : f32
    %31 = vector.broadcast %cst_18 : f32 to vector<12x128xf32>
    %32 = arith.maximumf %30, %31 : vector<12x128xf32>
    %c0_19 = arith.constant 0 : index
    %c0_20 = arith.constant 0 : index
    %33 = vector.load %arg7[%c0_19, %c0_20] : memref<1x12xbf16, #tpu.memory_space<vmem>>, vector<1x12xbf16>
    %34 = arith.truncf %32 : vector<12x128xf32> to vector<12x128xbf16>
    %cst_21 = arith.constant dense<0.000000e+00> : vector<1x128xf32>
    %35 = tpu.matmul %33, %34, %cst_21 {dimension_numbers = #tpu.dot_dimension_numbers<[1], [0], [0], [1], [0, 0, 1, 1], [], []>} : vector<1x12xbf16>, vector<12x128xbf16>, vector<1x128xf32> -> vector<1x128xf32>
    %c0_22 = arith.constant 0 : index
    %c0_23 = arith.constant 0 : index
    %36 = memref.load %arg8[%c0_22, %c0_23] : memref<1x1xf32, #tpu.memory_space<smem>>
    %37 = vector.broadcast %36 : f32 to vector<1x128xf32>
    %38 = arith.addf %35, %37 : vector<1x128xf32>
    %c0_24 = arith.constant 0 : index
    %c0_25 = arith.constant 0 : index
    %39 = vector.load %arg9[%c0_24, %c0_25] : memref<1x128xf32, #tpu.memory_space<vmem>>, vector<1x128xf32>
    tpu.vector_store %arg9[%c0_24, %c0_25], %38 {strides = array<i32>} : memref<1x128xf32, #tpu.memory_space<vmem>>, vector<1x128xf32>,
    return
  }
  func.func @transform_0(%arg0: i32) -> (i32, i32) {
    %c0_i32 = arith.constant 0 : i32
    %c0_i32_0 = arith.constant 0 : i32
    return %c0_i32, %arg0 : i32, i32
  }
  func.func @transform_1(%arg0: i32) -> (i32, i32) {
    %c0_i32 = arith.constant 0 : i32
    %c0_i32_0 = arith.constant 0 : i32
    return %c0_i32, %arg0 : i32, i32
  }
  func.func @transform_2(%arg0: i32) -> (i32, i32) {
    %c0_i32 = arith.constant 0 : i32
    %c0_i32_0 = arith.constant 0 : i32
    %c0_i32_1 = arith.constant 0 : i32
    return %c0_i32, %c0_i32_0 : i32, i32
  }
  func.func @transform_3(%arg0: i32) -> (i32, i32) {
    %c0_i32 = arith.constant 0 : i32
    %c0_i32_0 = arith.constant 0 : i32
    %c0_i32_1 = arith.constant 0 : i32
    return %c0_i32, %c0_i32_0 : i32, i32
  }
  func.func @transform_4(%arg0: i32) -> (i32, i32) {
    %c0_i32 = arith.constant 0 : i32
    %c0_i32_0 = arith.constant 0 : i32
    %c0_i32_1 = arith.constant 0 : i32
    return %c0_i32, %c0_i32_0 : i32, i32
  }
  func.func @transform_5(%arg0: i32) -> (i32, i32) {
    %c0_i32 = arith.constant 0 : i32
    %c0_i32_0 = arith.constant 0 : i32
    %c0_i32_1 = arith.constant 0 : i32
    return %c0_i32, %c0_i32_0 : i32, i32
  }
  func.func @transform_6(%arg0: i32) -> (i32, i32) {
    %c0_i32 = arith.constant 0 : i32
    %c0_i32_0 = arith.constant 0 : i32
    %c0_i32_1 = arith.constant 0 : i32
    return %c0_i32, %c0_i32_0 : i32, i32
  }
  func.func @transform_7(%arg0: i32) -> (i32, i32) {
    %c0_i32 = arith.constant 0 : i32
    %c0_i32_0 = arith.constant 0 : i32
    %c0_i32_1 = arith.constant 0 : i32
    return %c0_i32, %c0_i32_0 : i32, i32
  }
  func.func @transform_8(%arg0: i32) -> (i32, i32) {
    %c0_i32 = arith.constant 0 : i32
    %c0_i32_0 = arith.constant 0 : i32
    return %c0_i32, %arg0 : i32, i32
  }
}

</mosaic_0001>

<bundles_post_ra>
// kernel: tpu_custom_call.1
= control target key start
LH: loop header
LB: loop body
LE: loop exit
PB: predicated region body
PF: predicated region fallthrough
CT: control target
= control target key end

     0   :  { %v34_v1 = vlaneseq  ;;  %v392_v4 = vmov 0.0   ;;  %vm108_vm0 = vcmask 195584   ;;  %v393_v11 = vmov 0   ;;  %s502_s0 = inlined_call_operand.vmem [shape: s32[2,128], index: 0, kind: input, shape index: {}]   ;;  %s503_s1 = inlined_call_operand.vmem [shape: bf16[8,128], index: 1, kind: input, shape index: {}]   ;;  %s504_s2 = inlined_call_operand.vmem [shape: bf16[24,24], index: 2, kind: input, shape index: {}]   ;;  %s505_s3 = inlined_call_operand.vmem [shape: f32[24,1], index: 3, kind: input, shape index: {}]   ;;  %s506_s4 = inlined_call_operand.vmem [shape: bf16[12,24], index: 4, kind: input, shape index: {}]   ;;  %s507_s5 = inlined_call_operand.vmem [shape: f32[12,1], index: 5, kind: input, shape index: {}]   ;;  %s508_s6 = inlined_call_operand.vmem [shape: bf16[1,12], index: 6, kind: input, shape index: {}]   ;;  %s509_s7 = inlined_call_operand.<no memory space> [shape: f32[1,1], index: 7, kind: input, shape index: {}]   ;;  %s510_s8 = inlined_call_operand.hbm [shape: f32[1,128], index: 8, kind: output, shape index: {}]  }
   0x1   :  { %v32_v0 = vld [vmem:[%s502_s0] sm:$0x3]  ;;  %342 = vmatprep.subr.bf16.mxu1 %v392_v4  ;;  %361 = vset.pattern.permute.xlu0 %v393_v11  ;;  %v75_v12 = vld [vmem:[%s505_s3 + $0x10] sm:$0xff] }
   0x2   :  { %v65_v2 = vld [vmem:[%s503_s1] sm:$0xf]  ;;  %v33_v5 = vadd.s32 10, %v32_v0  ;;  %v35_v6 = vshrl.u32 %v34_v1, 7  ;;  %362 = vset.pattern.permute.xlu1 %v393_v11 }
   0x3   :  { %66 = vst [vmem:[#allocation2 + $0x8] sm:$0xf] %v65_v2  ;;  %v365_v3 = vld [vmem:[%s504_s2] sm:$0xff]   ;;  %88 = vperm.xlu1 %362, %v75_v12  }
   0x4   :  { %338 = vmatprep.mubr.msk.bf16.mxu0 %vm108_vm0, %v365_v3  ;;  %v73_v7 = vld [vmem:[%s505_s3] sm:$0xff]  ;;  %v36_v8 = vadd.s32 8, %v35_v6  ;;  %v39_v9 = vsub.s32 0, %v35_v6  ;;  %v45_v10 = vsub.s32 1, %v35_v6 }
   0x5   :  { %78 = vperm.xlu0 %361, %v73_v7  }
   0x6   :  { %14 = vsyncpa [#allocation5], 0  ;;  %v40_v13 = vrot.slane %v32_v0, %v39_v9  ;;  %v46_v14 = vrot.slane %v33_v5, %v45_v10  ;;  %v74_v15 = vld [vmem:[%s505_s3 + $0x8] sm:$0xff]  ;;  %v174_v16 = vld [vmem:[%s507_s5] sm:$0xff]  ;;  %vm115_vm7 = vcmask 1043456   ;;  %vm394_vm8 = vmmov 0  }
   0x7   :  { %178 = vperm.xlu1 %362, %v174_v16   ;;  %v175_v18 = vld [vmem:[%s507_s5 + $0x8] sm:$0xf]  ;;  %346 = vmatprep.mubr.msk.bf16.mxu1 %vm394_vm8, %v392_v4  ;;  %v367_v41 = vld [vmem:[%s506_s4] sm:$0x3f]   ;;  %vm248_vm9 = vcmask 1045504   ;;  %vm244_vm10 = vcmask 97280   ;;  %v243_v55 = vstv %s509_s7 }
   0x8   :  { %vm41_vm1 = vcmp.eq.s32.totalorder %v35_v6, %v40_v13  ;;  %vm42_vm2 = vcmp.eq.s32.totalorder %v36_v8, %v40_v13  ;;  %vm47_vm3 = vcmp.eq.s32.totalorder %v35_v6, %v46_v14  ;;  %vm48_vm4 = vcmp.eq.s32.totalorder %v36_v8, %v46_v14  ;;  %v366_v24 = vld [vmem:[%s504_s2 + $0x8] ss:$0 sps:$4 sm:$0xff]   ;;  %v240_v54 = vld [vmem:[%s508_s6] sm:$0x1]  ;;  %s395_s23 = smov [#allocation4]  }
   0x9   :  { %vm49_vm5 = vmor %vm41_vm1, %vm47_vm3  ;;  %83 = vperm.xlu0 %361, %v74_v15   ;;  %s299_s24 = sshll.u32 %s395_s23, 4  ;;  %s300_s24 = int_to_ptr.vmem [resolvable:$true] %s299_s24 }
   0xa   :  { %vm50_vm6 = vmor %vm42_vm2, %vm48_vm4  ;;  %v307_v17 = vsel %vm49_vm5, 1.0, %v392_v4  ;;  %v364_v21 = vld [vmem:[#allocation2 + $0x8] ss:$0 sps:$4 sm:$0xff]   ;;  %s368_s25 = scalar_lea.vmem %s300_s24, 16  ;;  %s372_s26 = scalar_lea.vmem %s300_s24, 32 }
   0xb   :  { %v308_v19 = vsel %vm50_vm6, 1.0, %v392_v4  ;;  %v117_v23 = vsel %vm115_vm7, %v364_v21, 0  ;;  %p369_p0 = scmp.ne.s32.totalorder %s300_s24, %s368_s25  ;;  %p373_p1 = scmp.lt.s32.totalorder %s300_s24, %s300_s24 }
   0xc   :  { %v323_v20 = vpack.c.bf16 %v308_v19, %v307_v17  ;;  %p374_p2 = scmp.lt.s32.totalorder %s372_s26, %s368_s25 }
   0xd   :  { %183 = vperm.xlu0 %361, %v175_v18  }
   0xe   :  { %324 = vst [vmem:[#allocation2] sm:$0xff] %v323_v20   ;;  %p375_p3 = por %p374_p2, %p373_p1 }
  0x10   :  { %p376_p4 = pnand %p375_p3, %p369_p0 }
  0x15   :  { %v363_v22 = vld [vmem:[#allocation2] sm:$0xff]  }
  0x16   :  { %334 = vmatprep.subr.bf16.mxu0 %v363_v22 }
  0x17   :  { %335 = vmatpush3.bf16.msra.mxu0 %v363_v22 }
  0x18   :  { %356 = vmatprep.subr.msk.bf16.mxu0 %vm115_vm7, %v364_v21 }
  0x1b   :  { %337 = vmatpush3.bf16.msra.mxu0 %v117_v23 }
  0x1c   :  { %350 = vmatprep.subr.bf16.mxu0 %v392_v4 }
  0x1e   :  { %339 = vmatmul.mubr.msk.bf16.vlgmr.msra.gmra.mrb[0].mxu0 %vm108_vm0, %v366_v24 }
  0x1f   :  { %352 = vmatprep.mubr.msk.bf16.mxu0 %vm394_vm8, %v392_v4 }
  0x82   :  { %v89_v26 = vpop.permute.xlu1 %88 }
  0x84   :  { %v79_v25 = vpop.permute.xlu0 %78 }
  0x86   :  { %v179_v42 = vpop.permute.xlu1 %178 }
  0x88   :  { %v84_v32 = vpop.permute.xlu0 %83 }
  0x8c   :  { %v184_v46 = vpop.permute.xlu0 %183 }
  0xf1   :  { %v340_v27 = vpop.f32.mrb[0].mxu0 }
  0xf2   :  { %v162_v28 = vadd.f32 %v340_v27, %v89_v26  ;;  %v153_v29 = vpop.f32.mrb[1].mxu0 }
  0xf3   :  { %v154_v30 = vadd.f32 %v153_v29, %v79_v25  ;;  %v341_v31 = vpop.f32.mrb[2].mxu0 }
  0xf4   :  { %v156_v33 = vpop.f32.mrb[3].mxu0  ;;  %v169_v35 = vmax.f32 %v162_v28, 0.0 }
  0xf5   :  { %v157_v34 = vadd.f32 %v156_v33, %v84_v32  ;;  %v167_v36 = vmax.f32 %v154_v30, 0.0 }
  0xf6   :  { %v173_v39 = vpack.c.bf16 %v169_v35, %v169_v35 }
  0xf7   :  { %v168_v37 = vmax.f32 %v157_v34, 0.0 }
  0xf8   :  { %v195_v40 = vsel %vm115_vm7, %v173_v39, 0 }
  0xf9   :  { %v172_v38 = vpack.c.bf16 %v168_v37, %v167_v36 }
  0xfb   :  { %343 = vmatpush3.bf16.msra.mxu1 %v172_v38 }
  0xfc   :  { %344 = vmatprep.subr.bf16.mxu1 %v392_v4 }
  0xff   :  { %345 = vmatpush3.bf16.msra.mxu1 %v195_v40 }
 0x102   :  { %347 = vmatmul.mubr.msk.bf16.vlgmr.msra.gmra.mrb[0].mxu1 %vm108_vm0, %v367_v41 }
 0x1d5   :  { %v231_v43 = vpop.f32.mrb[0].mxu1 }
 0x1d6   :  { %v232_v44 = vadd.f32 %v231_v43, %v179_v42  ;;  %v348_v45 = vpop.f32.mrb[1].mxu1 }
 0x1d7   :  { %v234_v47 = vpop.f32.mrb[2].mxu1 }
 0x1d8   :  { %v235_v48 = vadd.f32 %v234_v47, %v184_v46  ;;  %v349_v49 = vpop.f32.mrb[3].mxu1  ;;  %v238_v50 = vmax.f32 %v232_v44, 0.0 }
 0x1da   :  { %v239_v51 = vmax.f32 %v235_v48, 0.0 }
 0x1dc   :  { %v241_v52 = vpack.c.bf16 %v239_v51, %v238_v50 }
 0x1de   :  { %v250_v53 = vsel %vm248_vm9, %v241_v52, 0 }
 0x1df   :  { %351 = vmatpush3.bf16.msra.mxu0 %v250_v53 }
 0x1e2   :  { %353 = vmatmul.mubr.msk.bf16.vlgmr.msra.gmra.mrb[4].mxu0 %vm244_vm10, %v240_v54 }
 0x2b5   :  { %v286_v56 = vpop.f32.mrb[4].mxu0 }
 0x2b6   :  { %v287_v57 = vadd.f32 %v286_v56, %v243_v55  ;;  %v354_v58 = vpop.f32.mrb[5].mxu0 }
 0x2b7   :  { %v289_v59 = vpop.f32.mrb[6].mxu0 }
 0x2b8   :  { %292 = vst [vmem:[#allocation4] sm:$0x1] %v287_v57  ;;  %v355_v60 = vpop.f32.mrb[7].mxu0 }
 0x2b9   :  { %379 = shalt.err (!%p376_p4)
}
 0x2ba   :  { %s380_s7 = scalar_lea.hbm %s510_s8, 16 }
 0x2bb   :  { %p381_p5 = scmp.ne.s32.totalorder %s510_s8, %s380_s7  ;;  %p384_p6 = scmp.lt.u32.totalorder %s380_s7, %s510_s8 }
 0x2bd   :  { %p386_p7 = pnand %p384_p6, %p381_p5 }
 0x2bf   :  { %389 = shalt.err (!%p386_p7)
}
 0x2c0   :  { %302 = dma.vmem_to_hbm [thread:$0]  %s300_s24, 16, %s510_s8, [#allocation5]  }
 0x2c1   :  { %390 = dma.done.wait [#allocation5], 16  }
 0x2c2   :  { %391 = vsyncadd [#allocation5], 4294967280 }
 0x2c3   :  { %306 = vsyncpa [#allocation5], 1 }

</bundles_post_ra>
